<compile_context>
chip_gen: v7x
topology: tpu7x:2x2x1
jax: 0.10.0
libtpu: 0.0.40
codegen_flags: <defaults>
</compile_context>

<pallas_src>
import jax
import jax.numpy as jnp
from jax.experimental import pallas as pl
from jax.experimental.pallas import tpu as pltpu

EPS = 1e-5
SUBLANE = 16            # bf16 sublane granule: one bf16 vreg is (16, 128)
DEFAULT_TM_MAX = 8192   # per-step activations stay well under VMEM even here
MIN_SPLIT_ROWS = 64     # only force >=2 grid steps above this many batch rows


def _round_up(n, m):
    return (n + m - 1) // m * m


def avila_mlp_kernel(x_ref, w1_ref, b1_ref, w2_ref, b2_ref, w3_ref, b3_ref,
                     o_ref):
    """BN-folded MLP tile: 3 MXU matmuls (f32 accum) + 2 ReLUs, bf16 store."""
    x = x_ref[...]                                              # (TM, comps) bf16
    h1 = jnp.dot(x, w1_ref[...], preferred_element_type=jnp.float32)
    h1 = jnp.maximum(h1 + b1_ref[...], 0.0)                     # (TM, 50) f32
    h2 = jnp.dot(h1.astype(jnp.bfloat16), w2_ref[...],
                 preferred_element_type=jnp.float32)
    h2 = jnp.maximum(h2 + b2_ref[...], 0.0)                     # (TM, 70) f32
    logits = jnp.dot(h2.astype(jnp.bfloat16), w3_ref[...],
                     preferred_element_type=jnp.float32)
    o_ref[...] = (logits + b3_ref[...]).astype(o_ref.dtype)     # (TM, Cpad)


def avila_forward(x, params, *, tm=None, out_dtype=jnp.bfloat16):
    """Forward pass matching AvilaNNModelV1(x) in PyTorch training mode."""
    n, comps = x.shape
    h1_dim = params["w1"].shape[1]          # 50
    h2_dim = params["w2"].shape[1]          # 70
    classes = params["w3"].shape[1]

    # ---- Batch tiling: big tiles, 16-row aligned; guarantee >=2 grid steps
    #      when there is enough work so the "parallel" batch axis can shard
    #      across both TensorCores on v7x. ----
    n16 = _round_up(max(n, 1), SUBLANE)
    if tm is None:
        tm = DEFAULT_TM_MAX
    tm = _round_up(max(int(tm), SUBLANE), SUBLANE)      # guard arbitrary user tm
    if n16 >= MIN_SPLIT_ROWS:
        tm = min(tm, _round_up(pl.cdiv(n16, 2), SUBLANE))
    tm = min(tm, n16)
    n_steps = pl.cdiv(n16, tm)
    n_pad = n_steps * tm

    # ---- BatchNorm1d training-mode batch statistics (single fused pass) ----
    xf = x.astype(jnp.float32)
    mean = jnp.mean(xf, axis=0, keepdims=True)                          # (1, C)
    var = jnp.maximum(jnp.mean(xf * xf, axis=0, keepdims=True)
                      - mean * mean, 0.0)                               # biased
    scale = params["gamma"] * jax.lax.rsqrt(var + EPS)
    shift = params["beta"] - mean * scale

    # ---- Fold BN affine into lin1 (f32; single bf16 cast afterwards) ----
    w1f = params["w1"] * scale.reshape(comps, 1)                        # (C, 50)
    b1f = params["b1"] + shift @ params["w1"]                           # (1, 50)

    # ---- Pad lin3 out-dim only to the 16 granule (keeps writeback small) ----
    classes_pad = _round_up(classes, SUBLANE)
    w3p = jnp.pad(params["w3"], ((0, 0), (0, classes_pad - classes)))
    b3p = jnp.pad(params["b3"], ((0, 0), (0, classes_pad - classes)))

    # ---- bf16 MXU inputs (f32 accumulation inside the kernel) ----
    w1b = w1f.astype(jnp.bfloat16)
    w2b = params["w2"].astype(jnp.bfloat16)
    w3b = w3p.astype(jnp.bfloat16)

    # Row-pad + bf16 cast of x in one fused pass.
    xb = jnp.pad(x, ((0, n_pad - n), (0, 0))).astype(jnp.bfloat16)

    # Advisory cost hint so XLA schedules the tiny pre-pass around the call.
    flops = 2 * n_pad * (comps * h1_dim + h1_dim * h2_dim
                         + h2_dim * classes_pad)
    out_itemsize = jnp.dtype(out_dtype).itemsize
    bytes_accessed = int(
        n_pad * comps * 2                       # x tile reads (bf16)
        + n_pad * classes_pad * out_itemsize    # output writes
        + (comps * h1_dim + h1_dim * h2_dim + h2_dim * classes_pad) * 2
        + (h1_dim + h2_dim + classes_pad) * 4)  # weights + biases
    cost = pl.CostEstimate(flops=flops, transcendentals=0,
                           bytes_accessed=bytes_accessed)

    const = lambda i: (0, 0)   # weights/biases resident across grid steps

    out = pl.pallas_call(
        avila_mlp_kernel,
        out_shape=jax.ShapeDtypeStruct((n_pad, classes_pad), out_dtype),
        grid=(n_steps,),
        in_specs=[
            pl.BlockSpec((tm, comps), lambda i: (i, 0)),        # x tile (pipelined)
            pl.BlockSpec((comps, h1_dim), const),               # W1' (BN folded)
            pl.BlockSpec((1, h1_dim), const),                   # b1'
            pl.BlockSpec((h1_dim, h2_dim), const),              # W2
            pl.BlockSpec((1, h2_dim), const),                   # b2
            pl.BlockSpec((h2_dim, classes_pad), const),         # W3 (16-lane pad)
            pl.BlockSpec((1, classes_pad), const),              # b3 (16-lane pad)
        ],
        out_specs=pl.BlockSpec((tm, classes_pad), lambda i: (i, 0)),
        compiler_params=pltpu.CompilerParams(
            dimension_semantics=("parallel",),
            vmem_limit_bytes=32 * 1024 * 1024,
        ),
        cost_estimate=cost,
    )(xb, w1b, b1f, w2b, params["b2"], w3b, b3p)

    # Valid-region slice; cheap now (bf16, 16 cols) and fuses under jit.
    return out[:n, :classes]


def init_params(key, comps, classes):
    """Deterministic init mirroring PyTorch nn.Linear defaults."""
    ks = jax.random.split(key, 6)

    def lin(kw, kb, fan_in, fan_out):
        bound = 1.0 / jnp.sqrt(float(fan_in))
        w = jax.random.uniform(kw, (fan_in, fan_out), jnp.float32, -bound, bound)
        b = jax.random.uniform(kb, (1, fan_out), jnp.float32, -bound, bound)
        return w, b

    w1, b1 = lin(ks[0], ks[1], comps, 50)
    w2, b2 = lin(ks[2], ks[3], 50, 70)
    w3, b3 = lin(ks[4], ks[5], 70, classes)
    return {
        "gamma": jnp.ones((1, comps), jnp.float32),   # BN weight
        "beta": jnp.zeros((1, comps), jnp.float32),   # BN bias
        "w1": w1, "b1": b1,
        "w2": w2, "b2": b2,
        "w3": w3, "b3": b3,
    }


def reference_forward(x, params):
    """Pure-JAX f32 reference (PyTorch training-mode BN semantics)."""
    mean = jnp.mean(x, axis=0, keepdims=True)
    var = jnp.mean((x - mean) ** 2, axis=0, keepdims=True)
    xb = (x - mean) / jnp.sqrt(var + EPS) * params["gamma"] + params["beta"]
    h1 = jnp.maximum(xb @ params["w1"] + params["b1"], 0.0)
    h2 = jnp.maximum(h1 @ params["w2"] + params["b2"], 0.0)
    return h2 @ params["w3"] + params["b3"]


if __name__ == "__main__":
    comps, classes, batch = 10, 12, 500   # Avila: 10 features, 12 classes
    key = jax.random.PRNGKey(0)
    kx, kp = jax.random.split(key)
    x = jax.random.normal(kx, (batch, comps), jnp.float32)
    params = init_params(kp, comps, classes)

    # jit so the BN pre-pass / pad / cast fuse into a single pass around the kernel.
    fwd = jax.jit(avila_forward)

    # batch=500 -> 512 padded rows, tm=256, 2-step "parallel" grid (both v7x TCs).
    out = jax.block_until_ready(fwd(x, params))
    ref = reference_forward(x, params)
    assert out.shape == (batch, classes), out.shape
    err = jnp.max(jnp.abs(out.astype(jnp.float32) - ref))
    assert err < 5e-2, f"max abs err {err}"

    # Tiny-batch single-tile path (grid of 1).
    out2 = jax.block_until_ready(fwd(x[:8], params))
    ref2 = reference_forward(x[:8], params)
    assert out2.shape == (8, classes)
    assert jnp.max(jnp.abs(out2.astype(jnp.float32) - ref2)) < 5e-2

    # Arbitrary user tile size is sanitized (100 -> 112, multiple of 16).
    out3 = jax.block_until_ready(avila_forward(x, params, tm=100))
    assert out3.shape == (batch, classes)
    assert jnp.max(jnp.abs(out3.astype(jnp.float32) - ref)) < 5e-2

    print("KERNEL_OK")
</pallas_src>

<mosaic_0001>
module attributes {stable_mosaic.version = 11 : i64} {
  func.func @avila_mlp_kernel(%arg0: i32, %arg1: memref<256x10xbf16, #tpu.memory_space<vmem>>, %arg2: memref<10x50xbf16, #tpu.memory_space<vmem>>, %arg3: memref<1x50xf32, #tpu.memory_space<vmem>>, %arg4: memref<50x70xbf16, #tpu.memory_space<vmem>>, %arg5: memref<1x70xf32, #tpu.memory_space<vmem>>, %arg6: memref<70x16xbf16, #tpu.memory_space<vmem>>, %arg7: memref<1x16xf32, #tpu.memory_space<vmem>>, %arg8: memref<256x16xbf16, #tpu.memory_space<vmem>>) attributes {dimension_semantics = [#tpu.dimension_semantics<parallel>], iteration_bounds = array<i64: 2>, scalar_prefetch = 0 : i64, scratch_operands = 0 : i64, tpu.core_type = #tpu.core_type<tc>, window_params = [{transform_indices = @transform_0, window_bounds = array<i64: 256, 10>}, {pipeline_mode = #tpu.pipeline_mode<synchronous>, transform_indices = @transform_1, window_bounds = array<i64: 10, 50>}, {pipeline_mode = #tpu.pipeline_mode<synchronous>, transform_indices = @transform_2, window_bounds = array<i64: 1, 50>}, {pipeline_mode = #tpu.pipeline_mode<synchronous>, transform_indices = @transform_3, window_bounds = array<i64: 50, 70>}, {pipeline_mode = #tpu.pipeline_mode<synchronous>, transform_indices = @transform_4, window_bounds = array<i64: 1, 70>}, {pipeline_mode = #tpu.pipeline_mode<synchronous>, transform_indices = @transform_5, window_bounds = array<i64: 70, 16>}, {pipeline_mode = #tpu.pipeline_mode<synchronous>, transform_indices = @transform_6, window_bounds = array<i64: 1, 16>}, {transform_indices = @transform_7, window_bounds = array<i64: 256, 16>}]} {
    %c0 = arith.constant 0 : index
    %c0_0 = arith.constant 0 : index
    %0 = vector.load %arg1[%c0, %c0_0] : memref<256x10xbf16, #tpu.memory_space<vmem>>, vector<256x10xbf16>
    %c0_1 = arith.constant 0 : index
    %c0_2 = arith.constant 0 : index
    %1 = vector.load %arg2[%c0_1, %c0_2] : memref<10x50xbf16, #tpu.memory_space<vmem>>, vector<10x50xbf16>
    %cst = arith.constant dense<0.000000e+00> : vector<256x50xf32>
    %2 = tpu.matmul %0, %1, %cst {dimension_numbers = #tpu.dot_dimension_numbers<[1], [0], [0], [1], [0, 0, 1, 1], [], []>} : vector<256x10xbf16>, vector<10x50xbf16>, vector<256x50xf32> -> vector<256x50xf32>
    %c0_3 = arith.constant 0 : index
    %c0_4 = arith.constant 0 : index
    %3 = vector.load %arg3[%c0_3, %c0_4] : memref<1x50xf32, #tpu.memory_space<vmem>>, vector<1x50xf32>
    %4 = vector.broadcast %3 : vector<1x50xf32> to vector<256x50xf32>
    %5 = arith.addf %2, %4 : vector<256x50xf32>
    %cst_5 = arith.constant 0.000000e+00 : f32
    %6 = vector.broadcast %cst_5 : f32 to vector<256x50xf32>
    %7 = arith.maximumf %5, %6 : vector<256x50xf32>
    %8 = arith.truncf %7 : vector<256x50xf32> to vector<256x50xbf16>
    %c0_6 = arith.constant 0 : index
    %c0_7 = arith.constant 0 : index
    %9 = vector.load %arg4[%c0_6, %c0_7] : memref<50x70xbf16, #tpu.memory_space<vmem>>, vector<50x70xbf16>
    %cst_8 = arith.constant dense<0.000000e+00> : vector<256x70xf32>
    %10 = tpu.matmul %8, %9, %cst_8 {dimension_numbers = #tpu.dot_dimension_numbers<[1], [0], [0], [1], [0, 0, 1, 1], [], []>} : vector<256x50xbf16>, vector<50x70xbf16>, vector<256x70xf32> -> vector<256x70xf32>
    %c0_9 = arith.constant 0 : index
    %c0_10 = arith.constant 0 : index
    %11 = vector.load %arg5[%c0_9, %c0_10] : memref<1x70xf32, #tpu.memory_space<vmem>>, vector<1x70xf32>
    %12 = vector.broadcast %11 : vector<1x70xf32> to vector<256x70xf32>
    %13 = arith.addf %10, %12 : vector<256x70xf32>
    %cst_11 = arith.constant 0.000000e+00 : f32
    %14 = vector.broadcast %cst_11 : f32 to vector<256x70xf32>
    %15 = arith.maximumf %13, %14 : vector<256x70xf32>
    %16 = arith.truncf %15 : vector<256x70xf32> to vector<256x70xbf16>
    %c0_12 = arith.constant 0 : index
    %c0_13 = arith.constant 0 : index
    %17 = vector.load %arg6[%c0_12, %c0_13] : memref<70x16xbf16, #tpu.memory_space<vmem>>, vector<70x16xbf16>
    %cst_14 = arith.constant dense<0.000000e+00> : vector<256x16xf32>
    %18 = tpu.matmul %16, %17, %cst_14 {dimension_numbers = #tpu.dot_dimension_numbers<[1], [0], [0], [1], [0, 0, 1, 1], [], []>} : vector<256x70xbf16>, vector<70x16xbf16>, vector<256x16xf32> -> vector<256x16xf32>
    %c0_15 = arith.constant 0 : index
    %c0_16 = arith.constant 0 : index
    %19 = vector.load %arg7[%c0_15, %c0_16] : memref<1x16xf32, #tpu.memory_space<vmem>>, vector<1x16xf32>
    %20 = vector.broadcast %19 : vector<1x16xf32> to vector<256x16xf32>
    %21 = arith.addf %18, %20 : vector<256x16xf32>
    %22 = arith.truncf %21 : vector<256x16xf32> to vector<256x16xbf16>
    %c0_17 = arith.constant 0 : index
    %c0_18 = arith.constant 0 : index
    %23 = vector.load %arg8[%c0_17, %c0_18] : memref<256x16xbf16, #tpu.memory_space<vmem>>, vector<256x16xbf16>
    tpu.vector_store %arg8[%c0_17, %c0_18], %22 {strides = array<i32>} : memref<256x16xbf16, #tpu.memory_space<vmem>>, vector<256x16xbf16>,
    return
  }
  func.func @transform_0(%arg0: i32) -> (i32, i32) {
    %c0_i32 = arith.constant 0 : i32
    %c0_i32_0 = arith.constant 0 : i32
    return %arg0, %c0_i32 : i32, i32
  }
  func.func @transform_1(%arg0: i32) -> (i32, i32) {
    %c0_i32 = arith.constant 0 : i32
    %c0_i32_0 = arith.constant 0 : i32
    %c0_i32_1 = arith.constant 0 : i32
    return %c0_i32, %c0_i32_0 : i32, i32
  }
  func.func @transform_2(%arg0: i32) -> (i32, i32) {
    %c0_i32 = arith.constant 0 : i32
    %c0_i32_0 = arith.constant 0 : i32
    %c0_i32_1 = arith.constant 0 : i32
    return %c0_i32, %c0_i32_0 : i32, i32
  }
  func.func @transform_3(%arg0: i32) -> (i32, i32) {
    %c0_i32 = arith.constant 0 : i32
    %c0_i32_0 = arith.constant 0 : i32
    %c0_i32_1 = arith.constant 0 : i32
    return %c0_i32, %c0_i32_0 : i32, i32
  }
  func.func @transform_4(%arg0: i32) -> (i32, i32) {
    %c0_i32 = arith.constant 0 : i32
    %c0_i32_0 = arith.constant 0 : i32
    %c0_i32_1 = arith.constant 0 : i32
    return %c0_i32, %c0_i32_0 : i32, i32
  }
  func.func @transform_5(%arg0: i32) -> (i32, i32) {
    %c0_i32 = arith.constant 0 : i32
    %c0_i32_0 = arith.constant 0 : i32
    %c0_i32_1 = arith.constant 0 : i32
    return %c0_i32, %c0_i32_0 : i32, i32
  }
  func.func @transform_6(%arg0: i32) -> (i32, i32) {
    %c0_i32 = arith.constant 0 : i32
    %c0_i32_0 = arith.constant 0 : i32
    %c0_i32_1 = arith.constant 0 : i32
    return %c0_i32, %c0_i32_0 : i32, i32
  }
  func.func @transform_7(%arg0: i32) -> (i32, i32) {
    %c0_i32 = arith.constant 0 : i32
    %c0_i32_0 = arith.constant 0 : i32
    return %arg0, %c0_i32 : i32, i32
  }
}

</mosaic_0001>

<bundles_post_ra>
// kernel: avila_forward.1
= control target key start
LH: loop header
LB: loop body
LE: loop exit
PB: predicated region body
PF: predicated region fallthrough
CT: control target
= control target key end

     0   :  { %s1856_s24 = smov 0   ;;  %s2159_s0 = inlined_call_operand.vmem [shape: bf16[512,10], index: 0, kind: input, shape index: {}]   ;;  %s2160_s1 = inlined_call_operand.vmem [shape: bf16[10,50], index: 1, kind: input, shape index: {}]   ;;  %s2161_s2 = inlined_call_operand.vmem [shape: f32[1,50], index: 2, kind: input, shape index: {}]   ;;  %s2162_s3 = inlined_call_operand.vmem [shape: bf16[50,70], index: 3, kind: input, shape index: {}]   ;;  %s2163_s4 = inlined_call_operand.vmem [shape: f32[1,70], index: 4, kind: input, shape index: {}]   ;;  %s2164_s5 = inlined_call_operand.vmem [shape: bf16[70,16], index: 5, kind: input, shape index: {}]   ;;  %s2165_s6 = inlined_call_operand.vmem [shape: f32[1,16], index: 6, kind: input, shape index: {}]   ;;  %s2166_s7 = inlined_call_operand.vmem [shape: bf16[512,16], index: 7, kind: output, shape index: {}]  }
   0x1 LB: > { %s1442_s25 = sadd.s32 4294967295, %s1814_s24   ;;  %p1446_p0 = scmp.ge.s32.totalorder %s1814_s24, 1  ;;  %s1814_s24 = sphi %s1856_s24, %s17_s24  }
   0x2   : > { %p238_p1 = scmp.lt.s32.totalorder %s1814_s24, 3 }
   0x4   : > { %p239_p2 = pnand %p1446_p0, %p238_p1 }
   0x5   : > { %v1782_v0 = vld [vmem:[%s2160_s1] sm:$0x1f] (!%p239_p2)   ;;  %vm458_vm0 = vcmask (!%p239_p2), 1044480   ;;  %s1447_s28 = sshll.u32 (!%p239_p2), %s1442_s25, 5  ;;  %vm409_vm1 = vcmask (!%p239_p2), 80896   ;;  %v1800_v9 = vld [vmem:[%s2162_s3 + $0x8] sm:$0xff] (!%p239_p2)  }
   0x6   : > { %242 = sbr.rel (%p239_p2) target bundleno = 738 (0x2e2), region = 48  ;;  %v1799_v1 = vld [vmem:[%s2162_s3] sm:$0xff] (!%p239_p2)   ;;  %1770 = vmatprep.subr.msk.bf16.mxu0 (!%p239_p2), %vm458_vm0, %v1782_v0  ;;  %v460_v2 = vsel (!%p239_p2), %vm458_vm0, %v1782_v0, 0  ;;  %p271_p3 = scmp.lt.s32.totalorder (!%p239_p2), %s1447_s28, 63  ;;  %1771 = vmatprep.subr.msk.bf16.mxu1 (!%p239_p2), %vm458_vm0, %v1782_v0  ;;  %v1801_v12 = vld [vmem:[%s2162_s3 + $0x10] sm:$0xff] (!%p239_p2)   ;;  %vm755_vm2 = vcmask (!%p239_p2), 1040384  }
   0x7   : > { %1653 = vmatpush3.bf16.msra.mxu0 (!%p239_p2), %v460_v2  ;;  %1769 = vmatpush3.bf16.msra.mxu1 (!%p239_p2), %v460_v2  ;;  %v1802_v21 = vld [vmem:[%s2162_s3 + $0x18] ss:$0 sps:$4 sm:$0x11] (!%p239_p2)   ;;  %v1803_v23 = vld [vmem:[%s2164_s5] sm:$0xff] (!%p239_p2)   ;;  %v1804_v24 = vld [vmem:[%s2164_s5 + $0x8] sm:$0xff] (!%p239_p2)   ;;  %vm706_vm3 = vcmask (!%p239_p2), 408576  }
   0x8   : > { %1686 = vmatprep.subr.bf16.mxu1 (!%p239_p2), %v1799_v1  ;;  %v757_v22 = vsel (!%p239_p2), %vm755_vm2, %v1802_v21, 0  ;;  %1726 = vmatprep.subr.bf16.mxu0 (!%p239_p2), %v1803_v23  ;;  %v1805_v25 = vld [vmem:[%s2164_s5 + $0x10] sm:$0xff] (!%p239_p2)   ;;  %v1806_v26 = vld [vmem:[%s2164_s5 + $0x18] sm:$0xff] (!%p239_p2)   ;;  %v1936_v27 = vld [vmem:[%s2161_s2] ss:$0 sm:$0xff] (!%p239_p2)  ;;  %vm1060_vm4 = vcmask (!%p239_p2), 1042432  }
   0x9   : > { %vm1011_vm5 = vcmask (!%p239_p2), 572416   ;;  %vm1353_vm6 = vcmask (!%p239_p2), 125952  }
   0xd   : > { %s2168_s28 = smov (!%p271_p3, %s1447_s28), 63 }
   0xe   : > { %s1448_s8 = sshll.u32 %s2168_s28, 2 }
   0xf   : > { %s1878_s11 = scalar_lea.vmem %s2159_s0, %s1448_s8  ;;  %s2059_s16 = scalar_lea.vmem %s2166_s7, %s1448_s8 }
  0x10   : > { %v1783_v3 = vld [vmem:[%s1878_s11] sm:$0xff]   ;;  %v1784_v4 = vld [vmem:[%s1878_s11 + $0x8] sm:$0xff]   ;;  %v1785_v5 = vld [vmem:[%s1878_s11 + $0x10] sm:$0xff]  }
  0x11   : > { %1654 = vmatprep.mubr.msk.bf16.mxu0 %vm409_vm1, %v1783_v3  ;;  %v1786_v6 = vld [vmem:[%s1878_s11 + $0x18] sm:$0xff]   ;;  %v1787_v7 = vld [vmem:[%s1878_s11 + $0x20] sm:$0xff]   ;;  %v1792_v10 = vld [vmem:[%s1878_s11 + $0x48] sm:$0xff]  }
  0x12   : > { %1655 = vmatmul.mubr.msk.bf16.vlgmr.msra.gmra.mrb[0].mxu0 %vm409_vm1, %v1784_v4  ;;  %v1791_v8 = vld [vmem:[%s1878_s11 + $0x40] sm:$0xff]   ;;  %v1793_v11 = vld [vmem:[%s1878_s11 + $0x50] sm:$0xff]   ;;  %v1788_v13 = vld [vmem:[%s1878_s11 + $0x28] sm:$0xff]  }
  0x13   : > { %1658 = vmatprep.mubr.msk.bf16.mxu0 %vm409_vm1, %v1785_v5  ;;  %1670 = vmatprep.mubr.msk.bf16.mxu1 %vm409_vm1, %v1791_v8  ;;  %v1794_v14 = vld [vmem:[%s1878_s11 + $0x58] sm:$0xff]   ;;  %v1789_v15 = vld [vmem:[%s1878_s11 + $0x30] sm:$0xff]   ;;  %v1795_v16 = vld [vmem:[%s1878_s11 + $0x60] sm:$0xff]  }
  0x14   : > { %1671 = vmatmul.mubr.msk.bf16.vlgmr.msra.gmra.mrb[0].mxu1 %vm409_vm1, %v1792_v10  ;;  %v1790_v17 = vld [vmem:[%s1878_s11 + $0x38] sm:$0xff]   ;;  %v1796_v18 = vld [vmem:[%s1878_s11 + $0x68] sm:$0xff]   ;;  %v1797_v19 = vld [vmem:[%s1878_s11 + $0x70] sm:$0xff]   ;;  %1727 = vmatpush3.bf16.msra.mxu0 %v1803_v23 }
  0x15   : > { %1674 = vmatprep.mubr.msk.bf16.mxu1 %vm409_vm1, %v1793_v11  ;;  %1687 = vmatpush3.bf16.msra.mxu1 %v1799_v1  ;;  %v1798_v20 = vld [vmem:[%s1878_s11 + $0x78] sm:$0xff]  }
  0x16   : > { %1688 = vmatprep.subr.bf16.mxu1 %v1800_v9  ;;  %1728 = vmatprep.subr.bf16.mxu0 %v1804_v24 }
  0x18   : > { %1729 = vmatpush3.bf16.msra.mxu0 %v1804_v24 }
  0x19   : > { %1689 = vmatpush3.bf16.msra.mxu1 %v1800_v9  ;;  %1730 = vmatprep.subr.bf16.mxu0 %v1805_v25 }
  0x1a   : > { %1659 = vmatmul.mubr.msk.bf16.gmra.mrb[4].mxu0 %vm409_vm1, %v1786_v6  ;;  %1690 = vmatprep.subr.bf16.mxu1 %v1801_v12 }
  0x1b   : > { %1662 = vmatprep.mubr.msk.bf16.mxu0 %vm409_vm1, %v1787_v7 }
  0x1c   : > { %1675 = vmatmul.mubr.msk.bf16.gmra.mrb[4].mxu1 %vm409_vm1, %v1794_v14  ;;  %1731 = vmatpush3.bf16.msra.mxu0 %v1805_v25 }
  0x1d   : > { %1678 = vmatprep.mubr.msk.bf16.mxu1 %vm409_vm1, %v1795_v16  ;;  %1691 = vmatpush3.bf16.msra.mxu1 %v1801_v12 }
  0x1e   : > { %1772 = vmatprep.subr.msk.bf16.mxu1 %vm755_vm2, %v1802_v21  ;;  %1732 = vmatprep.subr.bf16.mxu0 %v1806_v26 }
  0x20   : > { %1733 = vmatpush3.bf16.msra.mxu0 %v1806_v26 }
  0x21   : > { %1693 = vmatpush3.bf16.msra.mxu1 %v757_v22 }
  0x22   : > { %1663 = vmatmul.mubr.msk.bf16.gmra.mrb[8].mxu0 %vm409_vm1, %v1788_v13 }
  0x23   : > { %1666 = vmatprep.mubr.msk.bf16.mxu0 %vm409_vm1, %v1789_v15 }
  0x24   : > { %1679 = vmatmul.mubr.msk.bf16.gmra.mrb[8].mxu1 %vm409_vm1, %v1796_v18 }
  0x25   : > { %1682 = vmatprep.mubr.msk.bf16.mxu1 %vm409_vm1, %v1797_v19 }
  0x2a   : > { %1667 = vmatmul.mubr.msk.bf16.gmra.mrb[12].mxu0 %vm409_vm1, %v1790_v17 }
  0x2c   : > { %1683 = vmatmul.mubr.msk.bf16.gmra.mrb[12].mxu1 %vm409_vm1, %v1798_v20 }
  0xe5   : > { %v1656_v28 = vpop.f32.mrb[0].mxu0 }
  0xe6   : > { %v505_v29 = vadd.f32 %v1656_v28, %v1936_v27  ;;  %v496_v30 = vpop.f32.mrb[1].mxu0 }
  0xe7   : > { %v497_v31 = vadd.f32 %v1936_v27, %v496_v30  ;;  %v1657_v32 = vpop.f32.mrb[2].mxu0  ;;  %v1672_v43 = vpop.f32.mrb[0].mxu1 }
  0xe8   : > { %v508_v33 = vadd.f32 %v1657_v32, %v1936_v27  ;;  %v499_v34 = vpop.f32.mrb[3].mxu0  ;;  %v625_v36 = vmax.f32 %v505_v29, 0.0  ;;  %v569_v46 = vadd.f32 %v1672_v43, %v1936_v27  ;;  %v560_v47 = vpop.f32.mrb[1].mxu1 }
  0xe9   : > { %v500_v35 = vadd.f32 %v1936_v27, %v499_v34  ;;  %v623_v38 = vmax.f32 %v497_v31, 0.0  ;;  %v561_v50 = vadd.f32 %v1936_v27, %v560_v47  ;;  %v1673_v51 = vpop.f32.mrb[2].mxu1 }
  0xea   : > { %v626_v37 = vmax.f32 %v508_v33, 0.0  ;;  %v641_v54 = vmax.f32 %v569_v46, 0.0  ;;  %v572_v55 = vadd.f32 %v1673_v51, %v1936_v27  ;;  %v563_v56 = vpop.f32.mrb[3].mxu1 }
  0xeb   : > { %v624_v39 = vmax.f32 %v500_v35, 0.0  ;;  %v639_v58 = vmax.f32 %v561_v50, 0.0  ;;  %v564_v59 = vadd.f32 %v1936_v27, %v563_v56 }
  0xec   : > { %v656_v40 = vpack.c.bf16 %v626_v37, %v625_v36  ;;  %v642_v62 = vmax.f32 %v572_v55, 0.0 }
  0xed   : > { %v655_v41 = vpack.c.bf16 %v624_v39, %v623_v38  ;;  %v1660_v42 = vpop.f32.mrb[4].mxu0  ;;  %v640_v1 = vmax.f32 %v564_v59, 0.0 }
  0xee   : > { %v521_v44 = vadd.f32 %v1660_v42, %v1936_v27  ;;  %v512_v45 = vpop.f32.mrb[5].mxu0  ;;  %v1952_v3 = vpack.c.bf16 %v642_v62, %v641_v54 }
  0xef   : > { %v513_v48 = vadd.f32 %v1936_v27, %v512_v45  ;;  %v1661_v49 = vpop.f32.mrb[6].mxu0  ;;  %1694 = vmatprep.mubr.msk.bf16.mxu1 %vm706_vm3, %v655_v41  ;;  %v1954_v6 = vpack.c.bf16 %v640_v1, %v639_v58  ;;  %v1676_v7 = vpop.f32.mrb[4].mxu1 }
  0xf0   : > { %v524_v52 = vadd.f32 %v1661_v49, %v1936_v27  ;;  %v515_v53 = vpop.f32.mrb[7].mxu0  ;;  %1695 = vmatmul.mubr.msk.bf16.vlgmr.msra.gmra.mrb[16].mxu1 %vm706_vm3, %v656_v40  ;;  %v629_v60 = vmax.f32 %v521_v44, 0.0  ;;  %v585_v10 = vadd.f32 %v1676_v7, %v1936_v27  ;;  %v576_v11 = vpop.f32.mrb[5].mxu1 }
  0xf1   : > { %v516_v57 = vadd.f32 %v1936_v27, %v515_v53  ;;  %v627_v63 = vmax.f32 %v513_v48, 0.0  ;;  %v577_v14 = vadd.f32 %v1936_v27, %v576_v11  ;;  %v1677_v15 = vpop.f32.mrb[6].mxu1 }
  0xf2   : > { %v630_v61 = vmax.f32 %v524_v52, 0.0  ;;  %v645_v18 = vmax.f32 %v585_v10, 0.0  ;;  %v588_v19 = vadd.f32 %v1677_v15, %v1936_v27  ;;  %v579_v20 = vpop.f32.mrb[7].mxu1 }
  0xf3   : > { %v628_v0 = vmax.f32 %v516_v57, 0.0  ;;  %v643_v22 = vmax.f32 %v577_v14, 0.0  ;;  %v580_v23 = vadd.f32 %v1936_v27, %v579_v20 }
  0xf4   : > { %v658_v2 = vpack.c.bf16 %v630_v61, %v629_v60  ;;  %v646_v26 = vmax.f32 %v588_v19, 0.0 }
  0xf5   : > { %v657_v4 = vpack.c.bf16 %v628_v0, %v627_v63  ;;  %v1664_v5 = vpop.f32.mrb[8].mxu0  ;;  %v644_v30 = vmax.f32 %v580_v23, 0.0 }
  0xf6   : > { %v537_v8 = vadd.f32 %v1664_v5, %v1936_v27  ;;  %v528_v9 = vpop.f32.mrb[9].mxu0  ;;  %v666_v32 = vpack.c.bf16 %v646_v26, %v645_v18 }
  0xf7   : > { %v529_v12 = vadd.f32 %v1936_v27, %v528_v9  ;;  %v1665_v13 = vpop.f32.mrb[10].mxu0  ;;  %1698 = vmatprep.mubr.msk.bf16.mxu1 %vm706_vm3, %v657_v4  ;;  %v665_v35 = vpack.c.bf16 %v644_v30, %v643_v22  ;;  %v1680_v36 = vpop.f32.mrb[8].mxu1 }
  0xf8   : > { %v540_v16 = vadd.f32 %v1665_v13, %v1936_v27  ;;  %v531_v17 = vpop.f32.mrb[11].mxu0  ;;  %1699 = vmatmul.mubr.msk.bf16.gmra.mrb[20].mxu1 %vm706_vm3, %v658_v2  ;;  %v633_v24 = vmax.f32 %v537_v8, 0.0  ;;  %v601_v39 = vadd.f32 %v1680_v36, %v1936_v27  ;;  %v592_v40 = vpop.f32.mrb[9].mxu1 }
  0xf9   : > { %v532_v21 = vadd.f32 %v1936_v27, %v531_v17  ;;  %v631_v28 = vmax.f32 %v529_v12, 0.0  ;;  %v593_v43 = vadd.f32 %v1936_v27, %v592_v40  ;;  %v1681_v44 = vpop.f32.mrb[10].mxu1 }
  0xfa   : > { %v634_v25 = vmax.f32 %v540_v16, 0.0  ;;  %v649_v47 = vmax.f32 %v601_v39, 0.0  ;;  %v604_v48 = vadd.f32 %v1681_v44, %v1936_v27  ;;  %v595_v49 = vpop.f32.mrb[11].mxu1 }
  0xfb   : > { %v632_v29 = vmax.f32 %v532_v21, 0.0  ;;  %v647_v51 = vmax.f32 %v593_v43, 0.0  ;;  %v596_v52 = vadd.f32 %v1936_v27, %v595_v49 }
  0xfc   : > { %v660_v31 = vpack.c.bf16 %v634_v25, %v633_v24  ;;  %v650_v55 = vmax.f32 %v604_v48, 0.0 }
  0xfd   : > { %v659_v33 = vpack.c.bf16 %v632_v29, %v631_v28  ;;  %v1668_v34 = vpop.f32.mrb[12].mxu0  ;;  %v648_v58 = vmax.f32 %v596_v52, 0.0 }
  0xfe   : > { %v553_v37 = vadd.f32 %v1668_v34, %v1936_v27  ;;  %v544_v38 = vpop.f32.mrb[13].mxu0  ;;  %v668_v60 = vpack.c.bf16 %v650_v55, %v649_v47 }
  0xff   : > { %v545_v41 = vadd.f32 %v1936_v27, %v544_v38  ;;  %v1669_v42 = vpop.f32.mrb[14].mxu0  ;;  %1702 = vmatprep.mubr.msk.bf16.mxu1 %vm706_vm3, %v659_v33  ;;  %v667_v62 = vpack.c.bf16 %v648_v58, %v647_v51  ;;  %v1684_v63 = vpop.f32.mrb[12].mxu1 }
 0x100   : > { %v556_v45 = vadd.f32 %v1669_v42, %v1936_v27  ;;  %v547_v46 = vpop.f32.mrb[15].mxu0  ;;  %1703 = vmatmul.mubr.msk.bf16.gmra.mrb[24].mxu1 %vm706_vm3, %v660_v31  ;;  %v637_v53 = vmax.f32 %v553_v37, 0.0  ;;  %v617_v0 = vadd.f32 %v1684_v63, %v1936_v27  ;;  %v608_v1 = vpop.f32.mrb[13].mxu1 }
 0x101   : > { %v548_v50 = vadd.f32 %v1936_v27, %v547_v46  ;;  %v635_v56 = vmax.f32 %v545_v41, 0.0  ;;  %v609_v2 = vadd.f32 %v1936_v27, %v608_v1  ;;  %v1685_v4 = vpop.f32.mrb[14].mxu1 }
 0x102   : > { %v638_v54 = vmax.f32 %v556_v45, 0.0  ;;  %v653_v5 = vmax.f32 %v617_v0, 0.0  ;;  %v620_v7 = vadd.f32 %v1685_v4, %v1936_v27  ;;  %v611_v8 = vpop.f32.mrb[15].mxu1 }
 0x103   : > { %v636_v57 = vmax.f32 %v548_v50, 0.0  ;;  %v651_v9 = vmax.f32 %v609_v2, 0.0  ;;  %v612_v10 = vadd.f32 %v1936_v27, %v611_v8  ;;  %v1807_v27 = vld [vmem:[%s2164_s5 + $0x20] ss:$0 sps:$4 sm:$0x77]  }
 0x104   : > { %v662_v59 = vpack.c.bf16 %v638_v54, %v637_v53  ;;  %v654_v11 = vmax.f32 %v620_v7, 0.0  ;;  %1773 = vmatprep.subr.msk.bf16.mxu0 %vm1060_vm4, %v1807_v27 }
 0x105   : > { %v661_v61 = vpack.c.bf16 %v636_v57, %v635_v56  ;;  %v652_v12 = vmax.f32 %v612_v10, 0.0 }
 0x106   : > { %v670_v13 = vpack.c.bf16 %v654_v11, %v653_v5 }
 0x107   : > { %1706 = vmatprep.mubr.msk.bf16.mxu1 %vm706_vm3, %v661_v61  ;;  %v669_v14 = vpack.c.bf16 %v652_v12, %v651_v9 }
 0x108   : > { %1707 = vmatmul.mubr.msk.bf16.gmra.mrb[28].mxu1 %vm706_vm3, %v662_v59 }
 0x109   : > { %1710 = vmatprep.mubr.msk.bf16.mxu1 %vm706_vm3, %v1954_v6  ;;  %v1062_v6 = vsel %vm1060_vm4, %v1807_v27, 0 }
 0x10a   : > { %1735 = vmatpush3.bf16.msra.mxu0 %v1062_v6 }
 0x110   : > { %1711 = vmatmul.mubr.msk.bf16.gmra.mrb[32].mxu1 %vm706_vm3, %v1952_v3  ;;  %v1998_v3 = vld [vmem:[%s2163_s4] ss:$0 sm:$0xff] }
 0x111   : > { %1714 = vmatprep.mubr.msk.bf16.mxu1 %vm706_vm3, %v665_v35 }
 0x118   : > { %1715 = vmatmul.mubr.msk.bf16.gmra.mrb[36].mxu1 %vm706_vm3, %v666_v32 }
 0x119   : > { %1718 = vmatprep.mubr.msk.bf16.mxu1 %vm706_vm3, %v667_v62 }
 0x120   : > { %1719 = vmatmul.mubr.msk.bf16.gmra.mrb[40].mxu1 %vm706_vm3, %v668_v60 }
 0x121   : > { %1722 = vmatprep.mubr.msk.bf16.mxu1 %vm706_vm3, %v669_v14 }
 0x128   : > { %1723 = vmatmul.mubr.msk.bf16.gmra.mrb[44].mxu1 %vm706_vm3, %v670_v13 }
 0x1c3   : > { %v1696_v15 = vpop.f32.mrb[16].mxu1 }
 0x1c4   : > { %v802_v16 = vadd.f32 %v1696_v15, %v1998_v3  ;;  %v793_v17 = vpop.f32.mrb[17].mxu1 }
 0x1c5   : > { %v794_v18 = vadd.f32 %v1998_v3, %v793_v17  ;;  %v1697_v19 = vpop.f32.mrb[18].mxu1 }
 0x1c6   : > { %v805_v20 = vadd.f32 %v1697_v19, %v1998_v3  ;;  %v796_v21 = vpop.f32.mrb[19].mxu1  ;;  %v922_v23 = vmax.f32 %v802_v16, 0.0 }
 0x1c7   : > { %v797_v22 = vadd.f32 %v1998_v3, %v796_v21  ;;  %v920_v25 = vmax.f32 %v794_v18, 0.0 }
 0x1c8   : > { %v923_v24 = vmax.f32 %v805_v20, 0.0 }
 0x1c9   : > { %v921_v26 = vmax.f32 %v797_v22, 0.0 }
 0x1ca   : > { %v953_v28 = vpack.c.bf16 %v923_v24, %v922_v23 }
 0x1cb   : > { %v952_v29 = vpack.c.bf16 %v921_v26, %v920_v25  ;;  %v1700_v30 = vpop.f32.mrb[20].mxu1 }
 0x1cc   : > { %v818_v31 = vadd.f32 %v1700_v30, %v1998_v3  ;;  %v809_v32 = vpop.f32.mrb[21].mxu1 }
 0x1cd   : > { %v810_v33 = vadd.f32 %v1998_v3, %v809_v32  ;;  %v1701_v34 = vpop.f32.mrb[22].mxu1  ;;  %1736 = vmatprep.mubr.msk.bf16.mxu0 %vm1011_vm5, %v952_v29 }
 0x1ce   : > { %v821_v35 = vadd.f32 %v1701_v34, %v1998_v3  ;;  %v812_v36 = vpop.f32.mrb[23].mxu1  ;;  %1737 = vmatmul.mubr.msk.bf16.vlgmr.msra.gmra.mrb[16].mxu0 %vm1011_vm5, %v953_v28  ;;  %v926_v38 = vmax.f32 %v818_v31, 0.0 }
 0x1cf   : > { %v813_v37 = vadd.f32 %v1998_v3, %v812_v36  ;;  %v924_v40 = vmax.f32 %v810_v33, 0.0 }
 0x1d0   : > { %v927_v39 = vmax.f32 %v821_v35, 0.0 }
 0x1d1   : > { %v925_v41 = vmax.f32 %v813_v37, 0.0 }
 0x1d2   : > { %v955_v42 = vpack.c.bf16 %v927_v39, %v926_v38 }
 0x1d3   : > { %v954_v43 = vpack.c.bf16 %v925_v41, %v924_v40  ;;  %v1704_v44 = vpop.f32.mrb[24].mxu1 }
 0x1d4   : > { %v834_v45 = vadd.f32 %v1704_v44, %v1998_v3  ;;  %v825_v46 = vpop.f32.mrb[25].mxu1 }
 0x1d5   : > { %v826_v47 = vadd.f32 %v1998_v3, %v825_v46  ;;  %v1705_v48 = vpop.f32.mrb[26].mxu1  ;;  %1740 = vmatprep.mubr.msk.bf16.mxu0 %vm1011_vm5, %v954_v43 }
 0x1d6   : > { %v837_v49 = vadd.f32 %v1705_v48, %v1998_v3  ;;  %v828_v50 = vpop.f32.mrb[27].mxu1  ;;  %1741 = vmatmul.mubr.msk.bf16.gmra.mrb[20].mxu0 %vm1011_vm5, %v955_v42  ;;  %v930_v52 = vmax.f32 %v834_v45, 0.0 }
 0x1d7   : > { %v829_v51 = vadd.f32 %v1998_v3, %v828_v50  ;;  %v928_v54 = vmax.f32 %v826_v47, 0.0 }
 0x1d8   : > { %v931_v53 = vmax.f32 %v837_v49, 0.0 }
 0x1d9   : > { %v929_v55 = vmax.f32 %v829_v51, 0.0 }
 0x1da   : > { %v957_v56 = vpack.c.bf16 %v931_v53, %v930_v52 }
 0x1db   : > { %v956_v57 = vpack.c.bf16 %v929_v55, %v928_v54  ;;  %v1708_v58 = vpop.f32.mrb[28].mxu1 }
 0x1dc   : > { %v850_v59 = vadd.f32 %v1708_v58, %v1998_v3  ;;  %v841_v60 = vpop.f32.mrb[29].mxu1 }
 0x1dd   : > { %v842_v61 = vadd.f32 %v1998_v3, %v841_v60  ;;  %v1709_v62 = vpop.f32.mrb[30].mxu1  ;;  %1744 = vmatprep.mubr.msk.bf16.mxu0 %vm1011_vm5, %v956_v57 }
 0x1de   : > { %v853_v63 = vadd.f32 %v1709_v62, %v1998_v3  ;;  %v844_v0 = vpop.f32.mrb[31].mxu1  ;;  %1745 = vmatmul.mubr.msk.bf16.gmra.mrb[24].mxu0 %vm1011_vm5, %v957_v56  ;;  %v934_v2 = vmax.f32 %v850_v59, 0.0 }
 0x1df   : > { %v845_v1 = vadd.f32 %v1998_v3, %v844_v0  ;;  %v932_v5 = vmax.f32 %v842_v61, 0.0 }
 0x1e0   : > { %v935_v4 = vmax.f32 %v853_v63, 0.0 }
 0x1e1   : > { %v933_v7 = vmax.f32 %v845_v1, 0.0  ;;  %v2051_v1 = vld [vmem:[%s2165_s6] ss:$0 sm:$0xff] }
 0x1e2   : > { %v959_v8 = vpack.c.bf16 %v935_v4, %v934_v2 }
 0x1e3   : > { %v958_v9 = vpack.c.bf16 %v933_v7, %v932_v5  ;;  %v1712_v10 = vpop.f32.mrb[32].mxu1 }
 0x1e4   : > { %v866_v11 = vadd.f32 %v1712_v10, %v1998_v3  ;;  %v857_v12 = vpop.f32.mrb[33].mxu1 }
 0x1e5   : > { %v858_v13 = vadd.f32 %v1998_v3, %v857_v12  ;;  %v1713_v14 = vpop.f32.mrb[34].mxu1  ;;  %1748 = vmatprep.mubr.msk.bf16.mxu0 %vm1011_vm5, %v958_v9 }
 0x1e6   : > { %v869_v27 = vadd.f32 %v1713_v14, %v1998_v3  ;;  %v860_v6 = vpop.f32.mrb[35].mxu1  ;;  %1749 = vmatmul.mubr.msk.bf16.gmra.mrb[28].mxu0 %vm1011_vm5, %v959_v8  ;;  %v938_v16 = vmax.f32 %v866_v11, 0.0 }
 0x1e7   : > { %v861_v15 = vadd.f32 %v1998_v3, %v860_v6  ;;  %v936_v18 = vmax.f32 %v858_v13, 0.0 }
 0x1e8   : > { %v939_v17 = vmax.f32 %v869_v27, 0.0 }
 0x1e9   : > { %v937_v19 = vmax.f32 %v861_v15, 0.0 }
 0x1ea   : > { %v961_v20 = vpack.c.bf16 %v939_v17, %v938_v16 }
 0x1eb   : > { %v960_v21 = vpack.c.bf16 %v937_v19, %v936_v18  ;;  %v1716_v22 = vpop.f32.mrb[36].mxu1 }
 0x1ec   : > { %v882_v23 = vadd.f32 %v1716_v22, %v1998_v3  ;;  %v873_v24 = vpop.f32.mrb[37].mxu1 }
 0x1ed   : > { %v874_v25 = vadd.f32 %v1998_v3, %v873_v24  ;;  %v1717_v26 = vpop.f32.mrb[38].mxu1  ;;  %1752 = vmatprep.mubr.msk.bf16.mxu0 %vm1011_vm5, %v960_v21 }
 0x1ee   : > { %v885_v28 = vadd.f32 %v1717_v26, %v1998_v3  ;;  %v876_v29 = vpop.f32.mrb[39].mxu1  ;;  %1753 = vmatmul.mubr.msk.bf16.gmra.mrb[32].mxu0 %vm1011_vm5, %v961_v20  ;;  %v942_v31 = vmax.f32 %v882_v23, 0.0 }
 0x1ef   : > { %v877_v30 = vadd.f32 %v1998_v3, %v876_v29  ;;  %v940_v33 = vmax.f32 %v874_v25, 0.0 }
 0x1f0   : > { %v943_v32 = vmax.f32 %v885_v28, 0.0 }
 0x1f1   : > { %v941_v34 = vmax.f32 %v877_v30, 0.0 }
 0x1f2   : > { %v963_v35 = vpack.c.bf16 %v943_v32, %v942_v31 }
 0x1f3   : > { %v962_v36 = vpack.c.bf16 %v941_v34, %v940_v33  ;;  %v1720_v37 = vpop.f32.mrb[40].mxu1 }
 0x1f4   : > { %v898_v38 = vadd.f32 %v1720_v37, %v1998_v3  ;;  %v889_v39 = vpop.f32.mrb[41].mxu1 }
 0x1f5   : > { %v890_v40 = vadd.f32 %v1998_v3, %v889_v39  ;;  %v1721_v41 = vpop.f32.mrb[42].mxu1  ;;  %1756 = vmatprep.mubr.msk.bf16.mxu0 %vm1011_vm5, %v962_v36 }
 0x1f6   : > { %v901_v42 = vadd.f32 %v1721_v41, %v1998_v3  ;;  %v892_v43 = vpop.f32.mrb[43].mxu1  ;;  %1757 = vmatmul.mubr.msk.bf16.gmra.mrb[36].mxu0 %vm1011_vm5, %v963_v35  ;;  %v946_v45 = vmax.f32 %v898_v38, 0.0 }
 0x1f7   : > { %v893_v44 = vadd.f32 %v1998_v3, %v892_v43  ;;  %v944_v47 = vmax.f32 %v890_v40, 0.0 }
 0x1f8   : > { %v947_v46 = vmax.f32 %v901_v42, 0.0 }
 0x1f9   : > { %v945_v48 = vmax.f32 %v893_v44, 0.0 }
 0x1fa   : > { %v965_v49 = vpack.c.bf16 %v947_v46, %v946_v45 }
 0x1fb   : > { %v964_v50 = vpack.c.bf16 %v945_v48, %v944_v47  ;;  %v1724_v51 = vpop.f32.mrb[44].mxu1 }
 0x1fc   : > { %v914_v52 = vadd.f32 %v1724_v51, %v1998_v3  ;;  %v905_v53 = vpop.f32.mrb[45].mxu1 }
 0x1fd   : > { %v906_v54 = vadd.f32 %v1998_v3, %v905_v53  ;;  %v1725_v55 = vpop.f32.mrb[46].mxu1  ;;  %1760 = vmatprep.mubr.msk.bf16.mxu0 %vm1011_vm5, %v964_v50 }
 0x1fe   : > { %v917_v56 = vadd.f32 %v1725_v55, %v1998_v3  ;;  %v908_v57 = vpop.f32.mrb[47].mxu1  ;;  %1761 = vmatmul.mubr.msk.bf16.gmra.mrb[40].mxu0 %vm1011_vm5, %v965_v49  ;;  %v950_v59 = vmax.f32 %v914_v52, 0.0 }
 0x1ff   : > { %v909_v58 = vadd.f32 %v1998_v3, %v908_v57  ;;  %v948_v61 = vmax.f32 %v906_v54, 0.0 }
 0x200   : > { %v951_v60 = vmax.f32 %v917_v56, 0.0 }
 0x201   : > { %v949_v62 = vmax.f32 %v909_v58, 0.0 }
 0x202   : > { %v967_v63 = vpack.c.bf16 %v951_v60, %v950_v59 }
 0x203   : > { %v966_v0 = vpack.c.bf16 %v949_v62, %v948_v61 }
 0x205   : > { %1764 = vmatprep.mubr.msk.bf16.mxu0 %vm1011_vm5, %v966_v0 }
 0x206   : > { %1765 = vmatmul.mubr.msk.bf16.gmra.mrb[44].mxu0 %vm1011_vm5, %v967_v63 }
 0x2a1   : > { %v1738_v2 = vpop.f32.mrb[16].mxu0 }
 0x2a2   : > { %v1107_v4 = vadd.f32 %v1738_v2, %v2051_v1  ;;  %v1098_v5 = vpop.f32.mrb[17].mxu0 }
 0x2a3   : > { %v1099_v3 = vadd.f32 %v2051_v1, %v1098_v5  ;;  %v1739_v7 = vpop.f32.mrb[18].mxu0 }
 0x2a4   : > { %v1564_v8 = vpack.c.bf16 %v1107_v4, %v1107_v4  ;;  %v1110_v9 = vadd.f32 %v1739_v7, %v2051_v1  ;;  %v1101_v10 = vpop.f32.mrb[19].mxu0 }
 0x2a5   : > { %v1562_v11 = vpack.c.bf16 %v1099_v3, %v1099_v3  ;;  %v1102_v12 = vadd.f32 %v2051_v1, %v1101_v10 }
 0x2a6   : > { %1356 = vst.msk [vmem:[%s2059_s16 + $0x8] sm:$0xf] %vm1353_vm6, %v1564_v8  ;;  %v1565_v13 = vpack.c.bf16 %v1110_v9, %v1110_v9 }
 0x2a7   : > { %1354 = vst.msk [vmem:[%s2059_s16] sm:$0xf] %vm1353_vm6, %v1562_v11  ;;  %v1563_v14 = vpack.c.bf16 %v1102_v12, %v1102_v12 }
 0x2a8   : > { %1357 = vst.msk [vmem:[%s2059_s16 + $0xc] sm:$0xf] %vm1353_vm6, %v1565_v13 }
 0x2a9   : > { %1355 = vst.msk [vmem:[%s2059_s16 + $0x4] sm:$0xf] %vm1353_vm6, %v1563_v14  ;;  %v1742_v27 = vpop.f32.mrb[20].mxu0 }
 0x2aa   : > { %v1123_v6 = vadd.f32 %v1742_v27, %v2051_v1  ;;  %v1114_v15 = vpop.f32.mrb[21].mxu0 }
 0x2ab   : > { %v1115_v16 = vadd.f32 %v2051_v1, %v1114_v15  ;;  %v1743_v17 = vpop.f32.mrb[22].mxu0 }
 0x2ac   : > { %v1568_v18 = vpack.c.bf16 %v1123_v6, %v1123_v6  ;;  %v1126_v19 = vadd.f32 %v1743_v17, %v2051_v1  ;;  %v1117_v20 = vpop.f32.mrb[23].mxu0 }
 0x2ad   : > { %v1566_v21 = vpack.c.bf16 %v1115_v16, %v1115_v16  ;;  %v1118_v22 = vadd.f32 %v2051_v1, %v1117_v20 }
 0x2ae   : > { %1360 = vst.msk [vmem:[%s2059_s16 + $0x18] sm:$0xf] %vm1353_vm6, %v1568_v18  ;;  %v1569_v23 = vpack.c.bf16 %v1126_v19, %v1126_v19 }
 0x2af   : > { %1358 = vst.msk [vmem:[%s2059_s16 + $0x10] sm:$0xf] %vm1353_vm6, %v1566_v21  ;;  %v1567_v24 = vpack.c.bf16 %v1118_v22, %v1118_v22 }
 0x2b0   : > { %1361 = vst.msk [vmem:[%s2059_s16 + $0x1c] sm:$0xf] %vm1353_vm6, %v1569_v23 }
 0x2b1   : > { %1359 = vst.msk [vmem:[%s2059_s16 + $0x14] sm:$0xf] %vm1353_vm6, %v1567_v24  ;;  %v1746_v25 = vpop.f32.mrb[24].mxu0 }
 0x2b2   : > { %v1139_v26 = vadd.f32 %v1746_v25, %v2051_v1  ;;  %v1130_v28 = vpop.f32.mrb[25].mxu0 }
 0x2b3   : > { %v1131_v29 = vadd.f32 %v2051_v1, %v1130_v28  ;;  %v1747_v30 = vpop.f32.mrb[26].mxu0 }
 0x2b4   : > { %v1572_v31 = vpack.c.bf16 %v1139_v26, %v1139_v26  ;;  %v1142_v32 = vadd.f32 %v1747_v30, %v2051_v1  ;;  %v1133_v33 = vpop.f32.mrb[27].mxu0 }
 0x2b5   : > { %v1570_v34 = vpack.c.bf16 %v1131_v29, %v1131_v29  ;;  %v1134_v35 = vadd.f32 %v2051_v1, %v1133_v33 }
 0x2b6   : > { %1364 = vst.msk [vmem:[%s2059_s16 + $0x28] sm:$0xf] %vm1353_vm6, %v1572_v31  ;;  %v1573_v36 = vpack.c.bf16 %v1142_v32, %v1142_v32 }
 0x2b7   : > { %1362 = vst.msk [vmem:[%s2059_s16 + $0x20] sm:$0xf] %vm1353_vm6, %v1570_v34  ;;  %v1571_v37 = vpack.c.bf16 %v1134_v35, %v1134_v35 }
 0x2b8   : > { %1365 = vst.msk [vmem:[%s2059_s16 + $0x2c] sm:$0xf] %vm1353_vm6, %v1573_v36 }
 0x2b9   : > { %1363 = vst.msk [vmem:[%s2059_s16 + $0x24] sm:$0xf] %vm1353_vm6, %v1571_v37  ;;  %v1750_v38 = vpop.f32.mrb[28].mxu0 }
 0x2ba   : > { %v1155_v39 = vadd.f32 %v1750_v38, %v2051_v1  ;;  %v1146_v40 = vpop.f32.mrb[29].mxu0 }
 0x2bb   : > { %v1147_v41 = vadd.f32 %v2051_v1, %v1146_v40  ;;  %v1751_v42 = vpop.f32.mrb[30].mxu0 }
 0x2bc   : > { %v1576_v43 = vpack.c.bf16 %v1155_v39, %v1155_v39  ;;  %v1158_v44 = vadd.f32 %v1751_v42, %v2051_v1  ;;  %v1149_v45 = vpop.f32.mrb[31].mxu0 }
 0x2bd   : > { %v1574_v46 = vpack.c.bf16 %v1147_v41, %v1147_v41  ;;  %v1150_v47 = vadd.f32 %v2051_v1, %v1149_v45 }
 0x2be   : > { %1368 = vst.msk [vmem:[%s2059_s16 + $0x38] sm:$0xf] %vm1353_vm6, %v1576_v43  ;;  %v1577_v48 = vpack.c.bf16 %v1158_v44, %v1158_v44 }
 0x2bf   : > { %1366 = vst.msk [vmem:[%s2059_s16 + $0x30] sm:$0xf] %vm1353_vm6, %v1574_v46  ;;  %v1575_v49 = vpack.c.bf16 %v1150_v47, %v1150_v47 }
 0x2c0   : > { %1369 = vst.msk [vmem:[%s2059_s16 + $0x3c] sm:$0xf] %vm1353_vm6, %v1577_v48 }
 0x2c1   : > { %1367 = vst.msk [vmem:[%s2059_s16 + $0x34] sm:$0xf] %vm1353_vm6, %v1575_v49  ;;  %v1754_v50 = vpop.f32.mrb[32].mxu0 }
 0x2c2   : > { %v1171_v51 = vadd.f32 %v1754_v50, %v2051_v1  ;;  %v1162_v52 = vpop.f32.mrb[33].mxu0 }
 0x2c3   : > { %v1163_v53 = vadd.f32 %v2051_v1, %v1162_v52  ;;  %v1755_v54 = vpop.f32.mrb[34].mxu0 }
 0x2c4   : > { %v1580_v55 = vpack.c.bf16 %v1171_v51, %v1171_v51  ;;  %v1174_v56 = vadd.f32 %v1755_v54, %v2051_v1  ;;  %v1165_v57 = vpop.f32.mrb[35].mxu0 }
 0x2c5   : > { %v1578_v58 = vpack.c.bf16 %v1163_v53, %v1163_v53  ;;  %v1166_v59 = vadd.f32 %v2051_v1, %v1165_v57 }
 0x2c6   : > { %1372 = vst.msk [vmem:[%s2059_s16 + $0x48] sm:$0xf] %vm1353_vm6, %v1580_v55  ;;  %v1581_v60 = vpack.c.bf16 %v1174_v56, %v1174_v56 }
 0x2c7   : > { %1370 = vst.msk [vmem:[%s2059_s16 + $0x40] sm:$0xf] %vm1353_vm6, %v1578_v58  ;;  %v1579_v61 = vpack.c.bf16 %v1166_v59, %v1166_v59 }
 0x2c8   : > { %1373 = vst.msk [vmem:[%s2059_s16 + $0x4c] sm:$0xf] %vm1353_vm6, %v1581_v60 }
 0x2c9   : > { %1371 = vst.msk [vmem:[%s2059_s16 + $0x44] sm:$0xf] %vm1353_vm6, %v1579_v61  ;;  %v1758_v62 = vpop.f32.mrb[36].mxu0 }
 0x2ca   : > { %v1187_v63 = vadd.f32 %v1758_v62, %v2051_v1  ;;  %v1178_v0 = vpop.f32.mrb[37].mxu0 }
 0x2cb   : > { %v1179_v2 = vadd.f32 %v2051_v1, %v1178_v0  ;;  %v1759_v4 = vpop.f32.mrb[38].mxu0 }
 0x2cc   : > { %v1584_v5 = vpack.c.bf16 %v1187_v63, %v1187_v63  ;;  %v1190_v3 = vadd.f32 %v1759_v4, %v2051_v1  ;;  %v1181_v7 = vpop.f32.mrb[39].mxu0 }
 0x2cd   : > { %v1582_v8 = vpack.c.bf16 %v1179_v2, %v1179_v2  ;;  %v1182_v9 = vadd.f32 %v2051_v1, %v1181_v7 }
 0x2ce   : > { %1376 = vst.msk [vmem:[%s2059_s16 + $0x58] sm:$0xf] %vm1353_vm6, %v1584_v5  ;;  %v1585_v10 = vpack.c.bf16 %v1190_v3, %v1190_v3 }
 0x2cf   : > { %1374 = vst.msk [vmem:[%s2059_s16 + $0x50] sm:$0xf] %vm1353_vm6, %v1582_v8  ;;  %v1583_v11 = vpack.c.bf16 %v1182_v9, %v1182_v9 }
 0x2d0   : > { %1377 = vst.msk [vmem:[%s2059_s16 + $0x5c] sm:$0xf] %vm1353_vm6, %v1585_v10 }
 0x2d1   : > { %1375 = vst.msk [vmem:[%s2059_s16 + $0x54] sm:$0xf] %vm1353_vm6, %v1583_v11  ;;  %v1762_v12 = vpop.f32.mrb[40].mxu0 }
 0x2d2   : > { %v1203_v13 = vadd.f32 %v1762_v12, %v2051_v1  ;;  %v1194_v14 = vpop.f32.mrb[41].mxu0 }
 0x2d3   : > { %v1195_v27 = vadd.f32 %v2051_v1, %v1194_v14  ;;  %v1763_v6 = vpop.f32.mrb[42].mxu0 }
 0x2d4   : > { %v1588_v15 = vpack.c.bf16 %v1203_v13, %v1203_v13  ;;  %v1206_v16 = vadd.f32 %v1763_v6, %v2051_v1  ;;  %v1197_v17 = vpop.f32.mrb[43].mxu0 }
 0x2d5   : > { %v1586_v18 = vpack.c.bf16 %v1195_v27, %v1195_v27  ;;  %v1198_v19 = vadd.f32 %v2051_v1, %v1197_v17 }
 0x2d6   : > { %1380 = vst.msk [vmem:[%s2059_s16 + $0x68] sm:$0xf] %vm1353_vm6, %v1588_v15  ;;  %v1589_v20 = vpack.c.bf16 %v1206_v16, %v1206_v16 }
 0x2d7   : > { %1378 = vst.msk [vmem:[%s2059_s16 + $0x60] sm:$0xf] %vm1353_vm6, %v1586_v18  ;;  %v1587_v21 = vpack.c.bf16 %v1198_v19, %v1198_v19 }
 0x2d8   : > { %1381 = vst.msk [vmem:[%s2059_s16 + $0x6c] sm:$0xf] %vm1353_vm6, %v1589_v20 }
 0x2d9   : > { %1379 = vst.msk [vmem:[%s2059_s16 + $0x64] sm:$0xf] %vm1353_vm6, %v1587_v21  ;;  %v1766_v22 = vpop.f32.mrb[44].mxu0 }
 0x2da   : > { %v1219_v23 = vadd.f32 %v1766_v22, %v2051_v1  ;;  %v1210_v24 = vpop.f32.mrb[45].mxu0 }
 0x2db   : > { %v1211_v25 = vadd.f32 %v2051_v1, %v1210_v24  ;;  %v1767_v26 = vpop.f32.mrb[46].mxu0 }
 0x2dc   : > { %v1592_v28 = vpack.c.bf16 %v1219_v23, %v1219_v23  ;;  %v1222_v29 = vadd.f32 %v1767_v26, %v2051_v1  ;;  %v1213_v30 = vpop.f32.mrb[47].mxu0 }
 0x2dd   : > { %v1590_v31 = vpack.c.bf16 %v1211_v25, %v1211_v25  ;;  %v1214_v32 = vadd.f32 %v2051_v1, %v1213_v30 }
 0x2de   : > { %1384 = vst.msk [vmem:[%s2059_s16 + $0x78] sm:$0xf] %vm1353_vm6, %v1592_v28  ;;  %v1593_v33 = vpack.c.bf16 %v1222_v29, %v1222_v29 }
 0x2df   : > { %1382 = vst.msk [vmem:[%s2059_s16 + $0x70] sm:$0xf] %vm1353_vm6, %v1590_v31  ;;  %v1591_v34 = vpack.c.bf16 %v1214_v32, %v1214_v32 }
 0x2e0   : > { %1385 = vst.msk [vmem:[%s2059_s16 + $0x7c] sm:$0xf] %vm1353_vm6, %v1593_v33 }
 0x2e1   : > { %1383 = vst.msk [vmem:[%s2059_s16 + $0x74] sm:$0xf] %vm1353_vm6, %v1591_v34 }
 0x2e2 PF: > { %s17_s24 = sadd.s32 1, %s1814_s24  }
 0x2e3   : > { %p14_p4 = scmp.ge.s32.totalorder %s17_s24, 4  }
 0x2e5   :  { %16 = sbr.rel (!%p14_p4) target bundleno = 1 (0x1), region = 78 }

</bundles_post_ra>
